<compile_context>
chip_gen: v7x
topology: tpu7x:2x2x1
jax: 0.10.0
libtpu: 0.0.40
codegen_flags: <defaults>
</compile_context>

<pallas_src>
import functools

import numpy as np
import jax
import jax.numpy as jnp
from jax import lax
from jax.experimental import pallas as pl
from jax.experimental.pallas import tpu as pltpu

_EPS = 2.220446049250313e-16  # float64 eps used by the torch/np gaussian_2d


# ---------------------------------------------------------------------------
# Pallas kernel: one pixel tile per grid step, single pass over real objects
# ---------------------------------------------------------------------------
def _heatmap_kernel(xs_ref, ys_ref, a_ref, r2_ref, cls_ref, lo_ref, hi_ref,
                    hm_ref, *, n_slots, tile_rows, feat_w, unroll):
    t = pl.program_id(0)
    tile_elems = tile_rows * 128
    tile_start = t * tile_elems                 # first flat pixel of this tile
    tile_end = tile_start + tile_elems - 1

    # Lane-dense (tile_rows, 128) coordinate maps, built in-registers (no HBM
    # coordinate inputs / DMAs).  floor((k+0.5)/W) + one-ulp fix-up is exact
    # for any feature map with H*W < 2**23 pixels.
    sub = lax.broadcasted_iota(jnp.int32, (tile_rows, 128), 0)
    lane = lax.broadcasted_iota(jnp.int32, (tile_rows, 128), 1)
    kf = (sub * 128 + lane + tile_start).astype(jnp.float32)
    wf = jnp.float32(feat_w)
    rows = jnp.floor((kf + 0.5) / wf)
    cols = kf - rows * wf
    rows = rows + jnp.where(cols >= wf, 1.0, 0.0) - jnp.where(cols < 0.0, 1.0, 0.0)
    cols = kf - rows * wf

    hm_ref[...] = jnp.zeros_like(hm_ref)

    def body(k, carry):
        # Scalar gate: skip objects whose Gaussian window does not intersect
        # this pixel tile; padded/invalid slots carry sentinel windows that
        # never intersect, so no separate validity check is needed.
        @pl.when((lo_ref[k] <= tile_end) & (hi_ref[k] >= tile_start))
        def _():
            dx = cols - xs_ref[k]
            dy = rows - ys_ref[k]
            dx2 = dx * dx
            dy2 = dy * dy
            g = jnp.exp((dx2 + dy2) * a_ref[k])       # a = -1/(2*sigma^2)
            keep = (dx2 <= r2_ref[k]) & (dy2 <= r2_ref[k])
            c = cls_ref[k]                            # dynamic destination plane
            hm_ref[c] = jnp.maximum(hm_ref[c], jnp.where(keep, g, 0.0))
        return carry

    lax.fori_loop(0, n_slots, body, 0, unroll=unroll)


def _choose_num_tiles(p_rows):
    """Pixel row-tiling of the (p_rows, 128) slab.

    More tiles -> finer per-object window skipping and 2-TC balance on v7x,
    but +~0.35us grid-step overhead each.  Tile height must stay a multiple of
    8 sublanes (or equal the full slab).
    """
    for nt in (8, 4, 2):
        if p_rows % nt == 0 and (p_rows // nt) % 8 == 0 and (p_rows // nt) >= 32:
            return nt
    if p_rows % 2 == 0 and (p_rows // 2) % 8 == 0:
        return 2
    return 1


def draw_heatmaps(obj, total_cls, feat_h, feat_w):
    """Single fused pallas_call producing (total_cls, H, W) heatmaps."""
    n_pix = feat_h * feat_w
    p_rows = pl.cdiv(n_pix, 128)                 # lane-dense slab: (p_rows, 128)
    num_tiles = _choose_num_tiles(p_rows)
    tile_rows = p_rows // num_tiles

    n_slots = int(obj["xf"].shape[0])
    kernel = functools.partial(
        _heatmap_kernel, n_slots=n_slots, tile_rows=tile_rows, feat_w=feat_w,
        unroll=(True if n_slots <= 32 else 8))

    smem = pl.BlockSpec(memory_space=pltpu.MemorySpace.SMEM)
    hm_flat = pl.pallas_call(
        kernel,
        out_shape=jax.ShapeDtypeStruct((total_cls, p_rows, 128), jnp.float32),
        grid_spec=pltpu.PrefetchScalarGridSpec(
            num_scalar_prefetch=0,
            grid=(num_tiles,),
            in_specs=[smem, smem, smem, smem, smem, smem, smem],
            out_specs=pl.BlockSpec((total_cls, tile_rows, 128),
                                   lambda t: (0, t, 0)),
        ),
        compiler_params=pltpu.CompilerParams(
            dimension_semantics=("parallel",)),   # disjoint pixel tiles
    )(obj["xf"], obj["yf"], obj["a"], obj["r2"], obj["cls"],
      obj["win_lo"], obj["win_hi"])

    hm = hm_flat.reshape(total_cls, p_rows * 128)
    if p_rows * 128 != n_pix:
        # TODO(synk): this slice materializes an extra HBM copy; prefer feature
        # dims with H*W % 128 == 0 (true for this example) to avoid it.
        hm = hm[:, :n_pix]
    return hm.reshape(total_cls, feat_h, feat_w)


# ---------------------------------------------------------------------------
# Plain-JAX glue reproducing get_targets_single semantics
# ---------------------------------------------------------------------------
def _gaussian_radius(height, width, min_overlap):
    a1 = 1.0
    b1 = height + width
    c1 = width * height * (1.0 - min_overlap) / (1.0 + min_overlap)
    sq1 = jnp.sqrt(b1 * b1 - 4.0 * a1 * c1)
    r1 = (b1 + sq1) / 2.0
    a2 = 4.0
    b2 = 2.0 * (height + width)
    c2 = (1.0 - min_overlap) * width * height
    sq2 = jnp.sqrt(b2 * b2 - 4.0 * a2 * c2)
    r2 = (b2 + sq2) / 2.0
    a3 = 4.0 * min_overlap
    b3 = -2.0 * min_overlap * (height + width)
    c3 = (min_overlap - 1.0) * width * height
    sq3 = jnp.sqrt(b3 * b3 - 4.0 * a3 * c3)
    r3 = (b3 + sq3) / 2.0
    return jnp.minimum(jnp.minimum(r1, r2), r3)


def _task_object_params(gt_bboxes, gt_labels, flag, n_cls, train_cfg):
    max_objs = train_cfg["max_objs"] * train_cfg["dense_reg"]
    voxel_size = train_cfg["voxel_size"]
    pc_range = train_cfg["point_cloud_range"]
    osf = train_cfg["out_size_factor"]
    feat_w = train_cfg["grid_size"][0] // osf
    feat_h = train_cfg["grid_size"][1] // osf
    n_boxes = gt_bboxes.shape[0]

    # task split: boxes of this task, concatenated in (local) class order
    belongs = (gt_labels >= flag) & (gt_labels < flag + n_cls)
    local_cls = gt_labels - flag
    sort_key = jnp.where(belongs, local_cls, n_cls + 1)
    perm = jnp.argsort(sort_key, stable=True)
    count = jnp.sum(belongs.astype(jnp.int32))

    if n_boxes >= max_objs:
        orig = perm[:max_objs]
    else:
        orig = jnp.concatenate(
            [perm, jnp.zeros((max_objs - n_boxes,), perm.dtype)])
    slot = jnp.arange(max_objs, dtype=jnp.int32)
    slot_valid = (slot < count) & (slot < n_boxes)

    boxes_k = gt_bboxes[orig]                       # (max_objs, 9)
    cls_k = local_cls[orig].astype(jnp.int32)       # 0-based local class id

    width_s = boxes_k[:, 3] / voxel_size[0] / osf
    length_s = boxes_k[:, 4] / voxel_size[1] / osf
    size_ok = (width_s > 0) & (length_s > 0)

    radius = _gaussian_radius(length_s, width_s, train_cfg["gaussian_overlap"])
    radius = jnp.where(size_ok, radius, 0.0)
    radius_i = jnp.maximum(jnp.int32(train_cfg["min_radius"]),
                           jnp.floor(radius).astype(jnp.int32))

    coor_x = (boxes_k[:, 0] - pc_range[0]) / voxel_size[0] / osf
    coor_y = (boxes_k[:, 1] - pc_range[1]) / voxel_size[1] / osf
    x_i = coor_x.astype(jnp.int32)   # truncation toward zero == torch .to(int32)
    y_i = coor_y.astype(jnp.int32)
    in_bounds = (x_i >= 0) & (x_i < feat_w) & (y_i >= 0) & (y_i < feat_h)

    valid = slot_valid & size_ok & in_bounds

    ind = jnp.where(valid, y_i * feat_w + x_i, 0).astype(jnp.int32)
    mask = valid.astype(jnp.uint8)

    rot = boxes_k[:, 6]
    # Sanitize padded/invalid slots before the log so no -inf is ever created
    # (valid boxes are unchanged, identical to the torch reference).
    safe_dims = jnp.where(valid[:, None], boxes_k[:, 3:6], 1.0)
    anno = jnp.concatenate(
        [
            (coor_x - x_i.astype(jnp.float32))[:, None],
            (coor_y - y_i.astype(jnp.float32))[:, None],
            boxes_k[:, 2:3],
            jnp.log(safe_dims),            # norm_bbox=True
            jnp.sin(rot)[:, None],
            jnp.cos(rot)[:, None],
            boxes_k[:, 7:9],               # vx, vy
        ],
        axis=-1,
    )
    anno = jnp.where(valid[:, None], anno, 0.0).astype(jnp.float32)

    rf = radius_i.astype(jnp.float32)
    sigma = (2.0 * rf + 1.0) / 6.0                 # sigma = diameter / 6
    a = (-1.0 / (2.0 * sigma * sigma)).astype(jnp.float32)
    r2 = (rf * rf).astype(jnp.float32)

    # Flat-pixel window bounds for the in-kernel tile-intersection gate;
    # invalid slots get sentinel windows that never intersect any tile.
    row_lo = jnp.clip(y_i - radius_i, 0, feat_h - 1)
    row_hi = jnp.clip(y_i + radius_i, 0, feat_h - 1)
    win_lo = jnp.where(valid, row_lo * feat_w, 2 ** 30).astype(jnp.int32)
    win_hi = jnp.where(valid, row_hi * feat_w + (feat_w - 1),
                       -(2 ** 30)).astype(jnp.int32)

    return dict(xf=x_i.astype(jnp.float32), yf=y_i.astype(jnp.float32),
                rf=rf, a=a, r2=r2, cls=cls_k, valid=valid.astype(jnp.int32),
                win_lo=win_lo, win_hi=win_hi,
                ind=ind, mask=mask, anno=anno,
                feat_h=feat_h, feat_w=feat_w)


def _compact_objects(parts, n_boxes, total_cls):
    """Concatenate per-task slots and compact valid objects to the front.

    At most n_boxes slots can ever be valid across all tasks, so the kernel's
    object loop runs over min(n_boxes, total_slots) slots instead of
    n_tasks * max_objs * dense_reg.
    """
    cat = lambda key: jnp.concatenate([p[key] for p in parts])
    valid = cat("valid")
    order = jnp.argsort(jnp.where(valid == 1, 0, 1), stable=True)
    n_slots = max(1, min(int(n_boxes), int(order.shape[0])))
    sel = order[:n_slots]
    cls_g = jnp.clip(cat("cls_global"), 0, total_cls - 1)  # OOB-safe plane id
    return dict(xf=cat("xf")[sel], yf=cat("yf")[sel], a=cat("a")[sel],
                r2=cat("r2")[sel], cls=cls_g[sel],
                win_lo=cat("win_lo")[sel], win_hi=cat("win_hi")[sel])


def bevdepth_head_loss_forward(gt_bboxes_3d, gt_labels_3d, class_names, train_cfg):
    """Equivalent of BEVDepthHead_loss target generation for a single sample."""
    per_task = []
    flag = 0
    for names in class_names:
        n_cls = len(names)
        p = _task_object_params(gt_bboxes_3d, gt_labels_3d, flag, n_cls, train_cfg)
        p["cls_global"] = (p["cls"] + flag).astype(jnp.int32)
        per_task.append((p, flag, n_cls))
        flag += n_cls
    total_cls = flag
    feat_h = per_task[0][0]["feat_h"]
    feat_w = per_task[0][0]["feat_w"]

    compact = _compact_objects([p for p, _, _ in per_task],
                               gt_bboxes_3d.shape[0], total_cls)

    # single fused pallas_call for every task / class
    hm_all = draw_heatmaps(compact, total_cls, feat_h, feat_w)

    heatmaps, anno_boxes, inds, masks = [], [], [], []
    for p, fl, n_cls in per_task:
        heatmaps.append(hm_all[fl:fl + n_cls][None])   # (1, n_cls, H, W)
        anno_boxes.append(p["anno"][None])
        # TODO(synk): torch uses int64 for inds; JAX x64 is off so we emit int32.
        inds.append(p["ind"][None])
        masks.append(p["mask"][None])
    return heatmaps, anno_boxes, inds, masks


# ---------------------------------------------------------------------------
# Pure-JAX reference (original math incl. eps / abs terms) for a sanity check
# ---------------------------------------------------------------------------
def _ref_heatmaps(xs, ys, a, rs, cls_ids, valid, total_cls, H, W):
    rows = jnp.arange(H, dtype=jnp.float32)[:, None]
    cols = jnp.arange(W, dtype=jnp.float32)[None, :]
    hm = jnp.zeros((total_cls, H, W), jnp.float32)
    for k in range(int(xs.shape[0])):
        dx = cols - xs[k]
        dy = rows - ys[k]
        g = jnp.exp((dx * dx + dy * dy) * a[k])
        keep = ((jnp.abs(dx) <= rs[k]) & (jnp.abs(dy) <= rs[k])
                & (g >= _EPS) & (valid[k] == 1))
        g = jnp.where(keep, g, 0.0)
        c = jnp.clip(cls_ids[k], 0, total_cls - 1)
        hm = hm.at[c].max(g)
    return hm


if __name__ == "__main__":
    class_names = [["car", "truck"], ["pedestrian"]]
    total_cls = sum(len(n) for n in class_names)
    train_cfg = dict(
        max_objs=8,
        dense_reg=1,
        grid_size=[128, 128, 1],
        point_cloud_range=[-51.2, -51.2, -5.0, 51.2, 51.2, 3.0],
        voxel_size=[0.8, 0.8, 8.0],
        out_size_factor=4,               # feature map: 32 x 32 (H*W = 8*128)
        gaussian_overlap=0.1,
        min_radius=2,
        code_weights=[1.0] * 10,
    )

    key = jax.random.PRNGKey(0)
    kxy, kz, kdim, krot, kvel, klbl = jax.random.split(key, 6)
    n_obj = 6
    xy = jax.random.uniform(kxy, (n_obj, 2), minval=-40.0, maxval=40.0)
    z = jax.random.uniform(kz, (n_obj, 1), minval=-1.0, maxval=1.0)
    dims = jax.random.uniform(kdim, (n_obj, 3), minval=1.5, maxval=5.0)
    rot = jax.random.uniform(krot, (n_obj, 1), minval=-np.pi, maxval=np.pi)
    vel = jax.random.uniform(kvel, (n_obj, 2), minval=-2.0, maxval=2.0)
    gt_bboxes_3d = jnp.concatenate([xy, z, dims, rot, vel], axis=-1).astype(jnp.float32)
    gt_labels_3d = jax.random.randint(klbl, (n_obj,), 0, total_cls).astype(jnp.int32)

    heatmaps, anno_boxes, inds, masks = bevdepth_head_loss_forward(
        gt_bboxes_3d, gt_labels_3d, class_names, train_cfg)
    jax.block_until_ready((heatmaps, anno_boxes, inds, masks))

    # sanity check: fused Pallas heatmaps vs a pure-JAX reference of the
    # original (un-simplified) math, over ALL uncompacted slots
    xs, ys, aa, rs, cls_g, vld = [], [], [], [], [], []
    flag = 0
    feat_h = feat_w = None
    for names in class_names:
        n_cls = len(names)
        p = _task_object_params(gt_bboxes_3d, gt_labels_3d, flag, n_cls, train_cfg)
        xs.append(p["xf"]); ys.append(p["yf"]); aa.append(p["a"]); rs.append(p["rf"])
        cls_g.append((p["cls"] + flag).astype(jnp.int32)); vld.append(p["valid"])
        feat_h, feat_w = p["feat_h"], p["feat_w"]
        flag += n_cls
    ref = _ref_heatmaps(jnp.concatenate(xs), jnp.concatenate(ys),
                        jnp.concatenate(aa), jnp.concatenate(rs),
                        jnp.concatenate(cls_g), jnp.concatenate(vld),
                        flag, feat_h, feat_w)
    got = jnp.concatenate([h[0] for h in heatmaps], axis=0)
    np.testing.assert_allclose(np.asarray(got), np.asarray(ref),
                               rtol=1e-5, atol=1e-5)

    print("KERNEL_OK")
</pallas_src>

<mosaic_0001>
module attributes {stable_mosaic.version = 11 : i64} {
  func.func @_heatmap_kernel(%arg0: i32, %arg1: memref<6xf32, #tpu.memory_space<smem>>, %arg2: memref<6xf32, #tpu.memory_space<smem>>, %arg3: memref<6xf32, #tpu.memory_space<smem>>, %arg4: memref<6xf32, #tpu.memory_space<smem>>, %arg5: memref<6xi32, #tpu.memory_space<smem>>, %arg6: memref<6xi32, #tpu.memory_space<smem>>, %arg7: memref<6xi32, #tpu.memory_space<smem>>, %arg8: memref<3x8x128xf32, #tpu.memory_space<vmem>>) attributes {dimension_semantics = [#tpu.dimension_semantics<parallel>], iteration_bounds = array<i64: 1>, scalar_prefetch = 0 : i64, scratch_operands = 0 : i64, tpu.core_type = #tpu.core_type<tc>, window_params = [{transform_indices = @transform_0, window_bounds = array<i64: 6>}, {transform_indices = @transform_1, window_bounds = array<i64: 6>}, {transform_indices = @transform_2, window_bounds = array<i64: 6>}, {transform_indices = @transform_3, window_bounds = array<i64: 6>}, {transform_indices = @transform_4, window_bounds = array<i64: 6>}, {transform_indices = @transform_5, window_bounds = array<i64: 6>}, {transform_indices = @transform_6, window_bounds = array<i64: 6>}, {transform_indices = @transform_7, window_bounds = array<i64: 3, 8, 128>}]} {
    %c1024_i32 = arith.constant 1024 : i32
    %0 = arith.muli %arg0, %c1024_i32 : i32
    %c1024_i32_0 = arith.constant 1024 : i32
    %1 = arith.addi %0, %c1024_i32_0 : i32
    %c1_i32 = arith.constant 1 : i32
    %2 = arith.subi %1, %c1_i32 : i32
    %3 = tpu.iota {dimensions = array<i32: 0>} : vector<8x128xi32>
    %4 = tpu.iota {dimensions = array<i32: 1>} : vector<8x128xi32>
    %c128_i32 = arith.constant 128 : i32
    %5 = vector.broadcast %c128_i32 : i32 to vector<8x128xi32>
    %6 = arith.muli %3, %5 : vector<8x128xi32>
    %7 = arith.addi %6, %4 : vector<8x128xi32>
    %8 = vector.broadcast %0 : i32 to vector<8x128xi32>
    %9 = arith.addi %7, %8 : vector<8x128xi32>
    %10 = arith.sitofp %9 : vector<8x128xi32> to vector<8x128xf32>
    %cst = arith.constant 5.000000e-01 : f32
    %11 = vector.broadcast %cst : f32 to vector<8x128xf32>
    %12 = arith.addf %10, %11 : vector<8x128xf32>
    %cst_1 = arith.constant 3.200000e+01 : f32
    %13 = vector.broadcast %cst_1 : f32 to vector<8x128xf32>
    %14 = arith.divf %12, %13 : vector<8x128xf32>
    %15 = math.floor %14 : vector<8x128xf32>
    %cst_2 = arith.constant 3.200000e+01 : f32
    %16 = vector.broadcast %cst_2 : f32 to vector<8x128xf32>
    %17 = arith.mulf %15, %16 : vector<8x128xf32>
    %18 = arith.subf %10, %17 : vector<8x128xf32>
    %cst_3 = arith.constant 3.200000e+01 : f32
    %19 = vector.broadcast %cst_3 : f32 to vector<8x128xf32>
    %20 = arith.cmpf oge, %18, %19 : vector<8x128xf32>
    %cst_4 = arith.constant 1.000000e+00 : f32
    %cst_5 = arith.constant 0.000000e+00 : f32
    %21 = vector.broadcast %cst_4 : f32 to vector<8x128xf32>
    %22 = vector.broadcast %cst_5 : f32 to vector<8x128xf32>
    %23 = arith.select %20, %21, %22 : vector<8x128xi1>, vector<8x128xf32>
    %24 = arith.addf %15, %23 : vector<8x128xf32>
    %cst_6 = arith.constant 0.000000e+00 : f32
    %25 = vector.broadcast %cst_6 : f32 to vector<8x128xf32>
    %26 = arith.cmpf olt, %18, %25 : vector<8x128xf32>
    %cst_7 = arith.constant 1.000000e+00 : f32
    %cst_8 = arith.constant 0.000000e+00 : f32
    %27 = vector.broadcast %cst_7 : f32 to vector<8x128xf32>
    %28 = vector.broadcast %cst_8 : f32 to vector<8x128xf32>
    %29 = arith.select %26, %27, %28 : vector<8x128xi1>, vector<8x128xf32>
    %30 = arith.subf %24, %29 : vector<8x128xf32>
    %cst_9 = arith.constant 3.200000e+01 : f32
    %31 = vector.broadcast %cst_9 : f32 to vector<8x128xf32>
    %32 = arith.mulf %30, %31 : vector<8x128xf32>
    %33 = arith.subf %10, %32 : vector<8x128xf32>
    %cst_10 = arith.constant 0.000000e+00 : f32
    %34 = vector.broadcast %cst_10 : f32 to vector<3x8x128xf32>
    %c0 = arith.constant 0 : index
    %c0_11 = arith.constant 0 : index
    %c0_12 = arith.constant 0 : index
    %35 = vector.load %arg8[%c0, %c0_11, %c0_12] : memref<3x8x128xf32, #tpu.memory_space<vmem>>, vector<3x8x128xf32>
    tpu.vector_store %arg8[%c0, %c0_11, %c0_12], %34 {strides = array<i32>} : memref<3x8x128xf32, #tpu.memory_space<vmem>>, vector<3x8x128xf32>,
    %c0_i32 = arith.constant 0 : i32
    %36 = arith.index_cast %c0_i32 : i32 to index
    %37 = memref.load %arg6[%36] : memref<6xi32, #tpu.memory_space<smem>>
    %38 = arith.cmpi sle, %37, %2 : i32
    %39 = arith.index_cast %c0_i32 : i32 to index
    %40 = memref.load %arg7[%39] : memref<6xi32, #tpu.memory_space<smem>>
    %41 = arith.cmpi sge, %40, %0 : i32
    %42 = arith.andi %38, %41 : i1
    %43 = arith.extui %42 : i1 to i32
    %c0_i32_13 = arith.constant 0 : i32
    %44 = arith.cmpi ne, %43, %c0_i32_13 : i32
    scf.if %44 {
      %90 = arith.index_cast %c0_i32 : i32 to index
      %91 = memref.load %arg1[%90] : memref<6xf32, #tpu.memory_space<smem>>
      %92 = vector.broadcast %91 : f32 to vector<8x128xf32>
      %93 = arith.subf %33, %92 : vector<8x128xf32>
      %94 = arith.index_cast %c0_i32 : i32 to index
      %95 = memref.load %arg2[%94] : memref<6xf32, #tpu.memory_space<smem>>
      %96 = vector.broadcast %95 : f32 to vector<8x128xf32>
      %97 = arith.subf %30, %96 : vector<8x128xf32>
      %98 = arith.mulf %93, %93 : vector<8x128xf32>
      %99 = arith.mulf %97, %97 : vector<8x128xf32>
      %100 = arith.addf %98, %99 : vector<8x128xf32>
      %101 = arith.index_cast %c0_i32 : i32 to index
      %102 = memref.load %arg3[%101] : memref<6xf32, #tpu.memory_space<smem>>
      %103 = vector.broadcast %102 : f32 to vector<8x128xf32>
      %104 = arith.mulf %100, %103 : vector<8x128xf32>
      %105 = math.exp %104 : vector<8x128xf32>
      %106 = arith.index_cast %c0_i32 : i32 to index
      %107 = memref.load %arg4[%106] : memref<6xf32, #tpu.memory_space<smem>>
      %108 = vector.broadcast %107 : f32 to vector<8x128xf32>
      %109 = arith.cmpf ole, %98, %108 : vector<8x128xf32>
      %110 = arith.index_cast %c0_i32 : i32 to index
      %111 = memref.load %arg4[%110] : memref<6xf32, #tpu.memory_space<smem>>
      %112 = vector.broadcast %111 : f32 to vector<8x128xf32>
      %113 = arith.cmpf ole, %99, %112 : vector<8x128xf32>
      %114 = arith.andi %109, %113 : vector<8x128xi1>
      %115 = arith.index_cast %c0_i32 : i32 to index
      %116 = memref.load %arg5[%115] : memref<6xi32, #tpu.memory_space<smem>>
      %117 = arith.index_cast %116 : i32 to index
      %c0_20 = arith.constant 0 : index
      %c0_21 = arith.constant 0 : index
      %118 = vector.load %arg8[%117, %c0_20, %c0_21] : memref<3x8x128xf32, #tpu.memory_space<vmem>>, vector<1x8x128xf32>
      %119 = vector.shape_cast %118 : vector<1x8x128xf32> to vector<8x128xf32>
      %cst_22 = arith.constant 0.000000e+00 : f32
      %120 = vector.broadcast %cst_22 : f32 to vector<8x128xf32>
      %121 = arith.select %114, %105, %120 : vector<8x128xi1>, vector<8x128xf32>
      %122 = arith.maximumf %119, %121 : vector<8x128xf32>
      %123 = arith.index_cast %116 : i32 to index
      %c0_23 = arith.constant 0 : index
      %c0_24 = arith.constant 0 : index
      %124 = vector.load %arg8[%123, %c0_23, %c0_24] : memref<3x8x128xf32, #tpu.memory_space<vmem>>, vector<1x8x128xf32>
      %125 = vector.shape_cast %124 : vector<1x8x128xf32> to vector<8x128xf32>
      %126 = vector.shape_cast %122 : vector<8x128xf32> to vector<1x8x128xf32>
      tpu.vector_store %arg8[%123, %c0_23, %c0_24], %126 {strides = array<i32>} : memref<3x8x128xf32, #tpu.memory_space<vmem>>, vector<1x8x128xf32>,
    } else {
    }
    %c1_i32_14 = arith.constant 1 : i32
    %45 = arith.index_cast %c1_i32_14 : i32 to index
    %46 = memref.load %arg6[%45] : memref<6xi32, #tpu.memory_space<smem>>
    %47 = arith.cmpi sle, %46, %2 : i32
    %48 = arith.index_cast %c1_i32_14 : i32 to index
    %49 = memref.load %arg7[%48] : memref<6xi32, #tpu.memory_space<smem>>
    %50 = arith.cmpi sge, %49, %0 : i32
    %51 = arith.andi %47, %50 : i1
    %52 = arith.extui %51 : i1 to i32
    %c0_i32_15 = arith.constant 0 : i32
    %53 = arith.cmpi ne, %52, %c0_i32_15 : i32
    scf.if %53 {
      %90 = arith.index_cast %c1_i32_14 : i32 to index
      %91 = memref.load %arg1[%90] : memref<6xf32, #tpu.memory_space<smem>>
      %92 = vector.broadcast %91 : f32 to vector<8x128xf32>
      %93 = arith.subf %33, %92 : vector<8x128xf32>
      %94 = arith.index_cast %c1_i32_14 : i32 to index
      %95 = memref.load %arg2[%94] : memref<6xf32, #tpu.memory_space<smem>>
      %96 = vector.broadcast %95 : f32 to vector<8x128xf32>
      %97 = arith.subf %30, %96 : vector<8x128xf32>
      %98 = arith.mulf %93, %93 : vector<8x128xf32>
      %99 = arith.mulf %97, %97 : vector<8x128xf32>
      %100 = arith.addf %98, %99 : vector<8x128xf32>
      %101 = arith.index_cast %c1_i32_14 : i32 to index
      %102 = memref.load %arg3[%101] : memref<6xf32, #tpu.memory_space<smem>>
      %103 = vector.broadcast %102 : f32 to vector<8x128xf32>
      %104 = arith.mulf %100, %103 : vector<8x128xf32>
      %105 = math.exp %104 : vector<8x128xf32>
      %106 = arith.index_cast %c1_i32_14 : i32 to index
      %107 = memref.load %arg4[%106] : memref<6xf32, #tpu.memory_space<smem>>
      %108 = vector.broadcast %107 : f32 to vector<8x128xf32>
      %109 = arith.cmpf ole, %98, %108 : vector<8x128xf32>
      %110 = arith.index_cast %c1_i32_14 : i32 to index
      %111 = memref.load %arg4[%110] : memref<6xf32, #tpu.memory_space<smem>>
      %112 = vector.broadcast %111 : f32 to vector<8x128xf32>
      %113 = arith.cmpf ole, %99, %112 : vector<8x128xf32>
      %114 = arith.andi %109, %113 : vector<8x128xi1>
      %115 = arith.index_cast %c1_i32_14 : i32 to index
      %116 = memref.load %arg5[%115] : memref<6xi32, #tpu.memory_space<smem>>
      %117 = arith.index_cast %116 : i32 to index
      %c0_20 = arith.constant 0 : index
      %c0_21 = arith.constant 0 : index
      %118 = vector.load %arg8[%117, %c0_20, %c0_21] : memref<3x8x128xf32, #tpu.memory_space<vmem>>, vector<1x8x128xf32>
      %119 = vector.shape_cast %118 : vector<1x8x128xf32> to vector<8x128xf32>
      %cst_22 = arith.constant 0.000000e+00 : f32
      %120 = vector.broadcast %cst_22 : f32 to vector<8x128xf32>
      %121 = arith.select %114, %105, %120 : vector<8x128xi1>, vector<8x128xf32>
      %122 = arith.maximumf %119, %121 : vector<8x128xf32>
      %123 = arith.index_cast %116 : i32 to index
      %c0_23 = arith.constant 0 : index
      %c0_24 = arith.constant 0 : index
      %124 = vector.load %arg8[%123, %c0_23, %c0_24] : memref<3x8x128xf32, #tpu.memory_space<vmem>>, vector<1x8x128xf32>
      %125 = vector.shape_cast %124 : vector<1x8x128xf32> to vector<8x128xf32>
      %126 = vector.shape_cast %122 : vector<8x128xf32> to vector<1x8x128xf32>
      tpu.vector_store %arg8[%123, %c0_23, %c0_24], %126 {strides = array<i32>} : memref<3x8x128xf32, #tpu.memory_space<vmem>>, vector<1x8x128xf32>,
    } else {
    }
    %c2_i32 = arith.constant 2 : i32
    %54 = arith.index_cast %c2_i32 : i32 to index
    %55 = memref.load %arg6[%54] : memref<6xi32, #tpu.memory_space<smem>>
    %56 = arith.cmpi sle, %55, %2 : i32
    %57 = arith.index_cast %c2_i32 : i32 to index
    %58 = memref.load %arg7[%57] : memref<6xi32, #tpu.memory_space<smem>>
    %59 = arith.cmpi sge, %58, %0 : i32
    %60 = arith.andi %56, %59 : i1
    %61 = arith.extui %60 : i1 to i32
    %c0_i32_16 = arith.constant 0 : i32
    %62 = arith.cmpi ne, %61, %c0_i32_16 : i32
    scf.if %62 {
      %90 = arith.index_cast %c2_i32 : i32 to index
      %91 = memref.load %arg1[%90] : memref<6xf32, #tpu.memory_space<smem>>
      %92 = vector.broadcast %91 : f32 to vector<8x128xf32>
      %93 = arith.subf %33, %92 : vector<8x128xf32>
      %94 = arith.index_cast %c2_i32 : i32 to index
      %95 = memref.load %arg2[%94] : memref<6xf32, #tpu.memory_space<smem>>
      %96 = vector.broadcast %95 : f32 to vector<8x128xf32>
      %97 = arith.subf %30, %96 : vector<8x128xf32>
      %98 = arith.mulf %93, %93 : vector<8x128xf32>
      %99 = arith.mulf %97, %97 : vector<8x128xf32>
      %100 = arith.addf %98, %99 : vector<8x128xf32>
      %101 = arith.index_cast %c2_i32 : i32 to index
      %102 = memref.load %arg3[%101] : memref<6xf32, #tpu.memory_space<smem>>
      %103 = vector.broadcast %102 : f32 to vector<8x128xf32>
      %104 = arith.mulf %100, %103 : vector<8x128xf32>
      %105 = math.exp %104 : vector<8x128xf32>
      %106 = arith.index_cast %c2_i32 : i32 to index
      %107 = memref.load %arg4[%106] : memref<6xf32, #tpu.memory_space<smem>>
      %108 = vector.broadcast %107 : f32 to vector<8x128xf32>
      %109 = arith.cmpf ole, %98, %108 : vector<8x128xf32>
      %110 = arith.index_cast %c2_i32 : i32 to index
      %111 = memref.load %arg4[%110] : memref<6xf32, #tpu.memory_space<smem>>
      %112 = vector.broadcast %111 : f32 to vector<8x128xf32>
      %113 = arith.cmpf ole, %99, %112 : vector<8x128xf32>
      %114 = arith.andi %109, %113 : vector<8x128xi1>
      %115 = arith.index_cast %c2_i32 : i32 to index
      %116 = memref.load %arg5[%115] : memref<6xi32, #tpu.memory_space<smem>>
      %117 = arith.index_cast %116 : i32 to index
      %c0_20 = arith.constant 0 : index
      %c0_21 = arith.constant 0 : index
      %118 = vector.load %arg8[%117, %c0_20, %c0_21] : memref<3x8x128xf32, #tpu.memory_space<vmem>>, vector<1x8x128xf32>
      %119 = vector.shape_cast %118 : vector<1x8x128xf32> to vector<8x128xf32>
      %cst_22 = arith.constant 0.000000e+00 : f32
      %120 = vector.broadcast %cst_22 : f32 to vector<8x128xf32>
      %121 = arith.select %114, %105, %120 : vector<8x128xi1>, vector<8x128xf32>
      %122 = arith.maximumf %119, %121 : vector<8x128xf32>
      %123 = arith.index_cast %116 : i32 to index
      %c0_23 = arith.constant 0 : index
      %c0_24 = arith.constant 0 : index
      %124 = vector.load %arg8[%123, %c0_23, %c0_24] : memref<3x8x128xf32, #tpu.memory_space<vmem>>, vector<1x8x128xf32>
      %125 = vector.shape_cast %124 : vector<1x8x128xf32> to vector<8x128xf32>
      %126 = vector.shape_cast %122 : vector<8x128xf32> to vector<1x8x128xf32>
      tpu.vector_store %arg8[%123, %c0_23, %c0_24], %126 {strides = array<i32>} : memref<3x8x128xf32, #tpu.memory_space<vmem>>, vector<1x8x128xf32>,
    } else {
    }
    %c3_i32 = arith.constant 3 : i32
    %63 = arith.index_cast %c3_i32 : i32 to index
    %64 = memref.load %arg6[%63] : memref<6xi32, #tpu.memory_space<smem>>
    %65 = arith.cmpi sle, %64, %2 : i32
    %66 = arith.index_cast %c3_i32 : i32 to index
    %67 = memref.load %arg7[%66] : memref<6xi32, #tpu.memory_space<smem>>
    %68 = arith.cmpi sge, %67, %0 : i32
    %69 = arith.andi %65, %68 : i1
    %70 = arith.extui %69 : i1 to i32
    %c0_i32_17 = arith.constant 0 : i32
    %71 = arith.cmpi ne, %70, %c0_i32_17 : i32
    scf.if %71 {
      %90 = arith.index_cast %c3_i32 : i32 to index
      %91 = memref.load %arg1[%90] : memref<6xf32, #tpu.memory_space<smem>>
      %92 = vector.broadcast %91 : f32 to vector<8x128xf32>
      %93 = arith.subf %33, %92 : vector<8x128xf32>
      %94 = arith.index_cast %c3_i32 : i32 to index
      %95 = memref.load %arg2[%94] : memref<6xf32, #tpu.memory_space<smem>>
      %96 = vector.broadcast %95 : f32 to vector<8x128xf32>
      %97 = arith.subf %30, %96 : vector<8x128xf32>
      %98 = arith.mulf %93, %93 : vector<8x128xf32>
      %99 = arith.mulf %97, %97 : vector<8x128xf32>
      %100 = arith.addf %98, %99 : vector<8x128xf32>
      %101 = arith.index_cast %c3_i32 : i32 to index
      %102 = memref.load %arg3[%101] : memref<6xf32, #tpu.memory_space<smem>>
      %103 = vector.broadcast %102 : f32 to vector<8x128xf32>
      %104 = arith.mulf %100, %103 : vector<8x128xf32>
      %105 = math.exp %104 : vector<8x128xf32>
      %106 = arith.index_cast %c3_i32 : i32 to index
      %107 = memref.load %arg4[%106] : memref<6xf32, #tpu.memory_space<smem>>
      %108 = vector.broadcast %107 : f32 to vector<8x128xf32>
      %109 = arith.cmpf ole, %98, %108 : vector<8x128xf32>
      %110 = arith.index_cast %c3_i32 : i32 to index
      %111 = memref.load %arg4[%110] : memref<6xf32, #tpu.memory_space<smem>>
      %112 = vector.broadcast %111 : f32 to vector<8x128xf32>
      %113 = arith.cmpf ole, %99, %112 : vector<8x128xf32>
      %114 = arith.andi %109, %113 : vector<8x128xi1>
      %115 = arith.index_cast %c3_i32 : i32 to index
      %116 = memref.load %arg5[%115] : memref<6xi32, #tpu.memory_space<smem>>
      %117 = arith.index_cast %116 : i32 to index
      %c0_20 = arith.constant 0 : index
      %c0_21 = arith.constant 0 : index
      %118 = vector.load %arg8[%117, %c0_20, %c0_21] : memref<3x8x128xf32, #tpu.memory_space<vmem>>, vector<1x8x128xf32>
      %119 = vector.shape_cast %118 : vector<1x8x128xf32> to vector<8x128xf32>
      %cst_22 = arith.constant 0.000000e+00 : f32
      %120 = vector.broadcast %cst_22 : f32 to vector<8x128xf32>
      %121 = arith.select %114, %105, %120 : vector<8x128xi1>, vector<8x128xf32>
      %122 = arith.maximumf %119, %121 : vector<8x128xf32>
      %123 = arith.index_cast %116 : i32 to index
      %c0_23 = arith.constant 0 : index
      %c0_24 = arith.constant 0 : index
      %124 = vector.load %arg8[%123, %c0_23, %c0_24] : memref<3x8x128xf32, #tpu.memory_space<vmem>>, vector<1x8x128xf32>
      %125 = vector.shape_cast %124 : vector<1x8x128xf32> to vector<8x128xf32>
      %126 = vector.shape_cast %122 : vector<8x128xf32> to vector<1x8x128xf32>
      tpu.vector_store %arg8[%123, %c0_23, %c0_24], %126 {strides = array<i32>} : memref<3x8x128xf32, #tpu.memory_space<vmem>>, vector<1x8x128xf32>,
    } else {
    }
    %c4_i32 = arith.constant 4 : i32
    %72 = arith.index_cast %c4_i32 : i32 to index
    %73 = memref.load %arg6[%72] : memref<6xi32, #tpu.memory_space<smem>>
    %74 = arith.cmpi sle, %73, %2 : i32
    %75 = arith.index_cast %c4_i32 : i32 to index
    %76 = memref.load %arg7[%75] : memref<6xi32, #tpu.memory_space<smem>>
    %77 = arith.cmpi sge, %76, %0 : i32
    %78 = arith.andi %74, %77 : i1
    %79 = arith.extui %78 : i1 to i32
    %c0_i32_18 = arith.constant 0 : i32
    %80 = arith.cmpi ne, %79, %c0_i32_18 : i32
    scf.if %80 {
      %90 = arith.index_cast %c4_i32 : i32 to index
      %91 = memref.load %arg1[%90] : memref<6xf32, #tpu.memory_space<smem>>
      %92 = vector.broadcast %91 : f32 to vector<8x128xf32>
      %93 = arith.subf %33, %92 : vector<8x128xf32>
      %94 = arith.index_cast %c4_i32 : i32 to index
      %95 = memref.load %arg2[%94] : memref<6xf32, #tpu.memory_space<smem>>
      %96 = vector.broadcast %95 : f32 to vector<8x128xf32>
      %97 = arith.subf %30, %96 : vector<8x128xf32>
      %98 = arith.mulf %93, %93 : vector<8x128xf32>
      %99 = arith.mulf %97, %97 : vector<8x128xf32>
      %100 = arith.addf %98, %99 : vector<8x128xf32>
      %101 = arith.index_cast %c4_i32 : i32 to index
      %102 = memref.load %arg3[%101] : memref<6xf32, #tpu.memory_space<smem>>
      %103 = vector.broadcast %102 : f32 to vector<8x128xf32>
      %104 = arith.mulf %100, %103 : vector<8x128xf32>
      %105 = math.exp %104 : vector<8x128xf32>
      %106 = arith.index_cast %c4_i32 : i32 to index
      %107 = memref.load %arg4[%106] : memref<6xf32, #tpu.memory_space<smem>>
      %108 = vector.broadcast %107 : f32 to vector<8x128xf32>
      %109 = arith.cmpf ole, %98, %108 : vector<8x128xf32>
      %110 = arith.index_cast %c4_i32 : i32 to index
      %111 = memref.load %arg4[%110] : memref<6xf32, #tpu.memory_space<smem>>
      %112 = vector.broadcast %111 : f32 to vector<8x128xf32>
      %113 = arith.cmpf ole, %99, %112 : vector<8x128xf32>
      %114 = arith.andi %109, %113 : vector<8x128xi1>
      %115 = arith.index_cast %c4_i32 : i32 to index
      %116 = memref.load %arg5[%115] : memref<6xi32, #tpu.memory_space<smem>>
      %117 = arith.index_cast %116 : i32 to index
      %c0_20 = arith.constant 0 : index
      %c0_21 = arith.constant 0 : index
      %118 = vector.load %arg8[%117, %c0_20, %c0_21] : memref<3x8x128xf32, #tpu.memory_space<vmem>>, vector<1x8x128xf32>
      %119 = vector.shape_cast %118 : vector<1x8x128xf32> to vector<8x128xf32>
      %cst_22 = arith.constant 0.000000e+00 : f32
      %120 = vector.broadcast %cst_22 : f32 to vector<8x128xf32>
      %121 = arith.select %114, %105, %120 : vector<8x128xi1>, vector<8x128xf32>
      %122 = arith.maximumf %119, %121 : vector<8x128xf32>
      %123 = arith.index_cast %116 : i32 to index
      %c0_23 = arith.constant 0 : index
      %c0_24 = arith.constant 0 : index
      %124 = vector.load %arg8[%123, %c0_23, %c0_24] : memref<3x8x128xf32, #tpu.memory_space<vmem>>, vector<1x8x128xf32>
      %125 = vector.shape_cast %124 : vector<1x8x128xf32> to vector<8x128xf32>
      %126 = vector.shape_cast %122 : vector<8x128xf32> to vector<1x8x128xf32>
      tpu.vector_store %arg8[%123, %c0_23, %c0_24], %126 {strides = array<i32>} : memref<3x8x128xf32, #tpu.memory_space<vmem>>, vector<1x8x128xf32>,
    } else {
    }
    %c5_i32 = arith.constant 5 : i32
    %81 = arith.index_cast %c5_i32 : i32 to index
    %82 = memref.load %arg6[%81] : memref<6xi32, #tpu.memory_space<smem>>
    %83 = arith.cmpi sle, %82, %2 : i32
    %84 = arith.index_cast %c5_i32 : i32 to index
    %85 = memref.load %arg7[%84] : memref<6xi32, #tpu.memory_space<smem>>
    %86 = arith.cmpi sge, %85, %0 : i32
    %87 = arith.andi %83, %86 : i1
    %88 = arith.extui %87 : i1 to i32
    %c0_i32_19 = arith.constant 0 : i32
    %89 = arith.cmpi ne, %88, %c0_i32_19 : i32
    scf.if %89 {
      %90 = arith.index_cast %c5_i32 : i32 to index
      %91 = memref.load %arg1[%90] : memref<6xf32, #tpu.memory_space<smem>>
      %92 = vector.broadcast %91 : f32 to vector<8x128xf32>
      %93 = arith.subf %33, %92 : vector<8x128xf32>
      %94 = arith.index_cast %c5_i32 : i32 to index
      %95 = memref.load %arg2[%94] : memref<6xf32, #tpu.memory_space<smem>>
      %96 = vector.broadcast %95 : f32 to vector<8x128xf32>
      %97 = arith.subf %30, %96 : vector<8x128xf32>
      %98 = arith.mulf %93, %93 : vector<8x128xf32>
      %99 = arith.mulf %97, %97 : vector<8x128xf32>
      %100 = arith.addf %98, %99 : vector<8x128xf32>
      %101 = arith.index_cast %c5_i32 : i32 to index
      %102 = memref.load %arg3[%101] : memref<6xf32, #tpu.memory_space<smem>>
      %103 = vector.broadcast %102 : f32 to vector<8x128xf32>
      %104 = arith.mulf %100, %103 : vector<8x128xf32>
      %105 = math.exp %104 : vector<8x128xf32>
      %106 = arith.index_cast %c5_i32 : i32 to index
      %107 = memref.load %arg4[%106] : memref<6xf32, #tpu.memory_space<smem>>
      %108 = vector.broadcast %107 : f32 to vector<8x128xf32>
      %109 = arith.cmpf ole, %98, %108 : vector<8x128xf32>
      %110 = arith.index_cast %c5_i32 : i32 to index
      %111 = memref.load %arg4[%110] : memref<6xf32, #tpu.memory_space<smem>>
      %112 = vector.broadcast %111 : f32 to vector<8x128xf32>
      %113 = arith.cmpf ole, %99, %112 : vector<8x128xf32>
      %114 = arith.andi %109, %113 : vector<8x128xi1>
      %115 = arith.index_cast %c5_i32 : i32 to index
      %116 = memref.load %arg5[%115] : memref<6xi32, #tpu.memory_space<smem>>
      %117 = arith.index_cast %116 : i32 to index
      %c0_20 = arith.constant 0 : index
      %c0_21 = arith.constant 0 : index
      %118 = vector.load %arg8[%117, %c0_20, %c0_21] : memref<3x8x128xf32, #tpu.memory_space<vmem>>, vector<1x8x128xf32>
      %119 = vector.shape_cast %118 : vector<1x8x128xf32> to vector<8x128xf32>
      %cst_22 = arith.constant 0.000000e+00 : f32
      %120 = vector.broadcast %cst_22 : f32 to vector<8x128xf32>
      %121 = arith.select %114, %105, %120 : vector<8x128xi1>, vector<8x128xf32>
      %122 = arith.maximumf %119, %121 : vector<8x128xf32>
      %123 = arith.index_cast %116 : i32 to index
      %c0_23 = arith.constant 0 : index
      %c0_24 = arith.constant 0 : index
      %124 = vector.load %arg8[%123, %c0_23, %c0_24] : memref<3x8x128xf32, #tpu.memory_space<vmem>>, vector<1x8x128xf32>
      %125 = vector.shape_cast %124 : vector<1x8x128xf32> to vector<8x128xf32>
      %126 = vector.shape_cast %122 : vector<8x128xf32> to vector<1x8x128xf32>
      tpu.vector_store %arg8[%123, %c0_23, %c0_24], %126 {strides = array<i32>} : memref<3x8x128xf32, #tpu.memory_space<vmem>>, vector<1x8x128xf32>,
    } else {
    }
    %c6_i32 = arith.constant 6 : i32
    return
  }
  func.func @transform_0(%arg0: i32) -> i32 {
    %c0_i32 = arith.constant 0 : i32
    %c0_i32_0 = arith.constant 0 : i32
    return %c0_i32 : i32
  }
  func.func @transform_1(%arg0: i32) -> i32 {
    %c0_i32 = arith.constant 0 : i32
    %c0_i32_0 = arith.constant 0 : i32
    return %c0_i32 : i32
  }
  func.func @transform_2(%arg0: i32) -> i32 {
    %c0_i32 = arith.constant 0 : i32
    %c0_i32_0 = arith.constant 0 : i32
    return %c0_i32 : i32
  }
  func.func @transform_3(%arg0: i32) -> i32 {
    %c0_i32 = arith.constant 0 : i32
    %c0_i32_0 = arith.constant 0 : i32
    return %c0_i32 : i32
  }
  func.func @transform_4(%arg0: i32) -> i32 {
    %c0_i32 = arith.constant 0 : i32
    %c0_i32_0 = arith.constant 0 : i32
    return %c0_i32 : i32
  }
  func.func @transform_5(%arg0: i32) -> i32 {
    %c0_i32 = arith.constant 0 : i32
    %c0_i32_0 = arith.constant 0 : i32
    return %c0_i32 : i32
  }
  func.func @transform_6(%arg0: i32) -> i32 {
    %c0_i32 = arith.constant 0 : i32
    %c0_i32_0 = arith.constant 0 : i32
    return %c0_i32 : i32
  }
  func.func @transform_7(%arg0: i32) -> (i32, i32, i32) {
    %c0_i32 = arith.constant 0 : i32
    %c0_i32_0 = arith.constant 0 : i32
    %c0_i32_1 = arith.constant 0 : i32
    return %c0_i32, %arg0, %c0_i32_0 : i32, i32, i32
  }
}

</mosaic_0001>

<bundles_post_ra>
// kernel: tpu_custom_call.1
= control target key start
LH: loop header
LB: loop body
LE: loop exit
PB: predicated region body
PF: predicated region fallthrough
CT: control target
= control target key end

     0   :  { %12 = vsyncpa [#allocation4], 0  ;;  %s669_s0 = inlined_call_operand.hbm [shape: f32[6], index: 0, kind: input, shape index: {}]   ;;  %s670_s1 = inlined_call_operand.vmem [shape: f32[6], index: 1, kind: input, shape index: {}]   ;;  %s671_s2 = inlined_call_operand.vmem [shape: f32[6], index: 2, kind: input, shape index: {}]   ;;  %s672_s3 = inlined_call_operand.vmem [shape: f32[6], index: 3, kind: input, shape index: {}]   ;;  %s673_s4 = inlined_call_operand.vmem [shape: s32[6], index: 4, kind: input, shape index: {}]   ;;  %s674_s5 = inlined_call_operand.vmem [shape: s32[6], index: 5, kind: input, shape index: {}]   ;;  %s675_s6 = inlined_call_operand.vmem [shape: s32[6], index: 6, kind: input, shape index: {}]   ;;  %s676_s7 = inlined_call_operand.hbm [shape: f32[3,8,128], index: 7, kind: output, shape index: {}]  }
   0x1   :  { %13 = vsyncpa [#allocation5], 0 }
   0x2   :  { %14 = vsyncpa [#allocation8], 0 }
   0x3   :  { %15 = vsyncpa [#allocation11], 0 }
   0x4   :  { %16 = vsyncpa [#allocation14], 0  ;;  %s42_s26 = sshll.u32 %s671_s2, 4  ;;  %s43_s26 = int_to_ptr.vmem [resolvable:$true] %s42_s26 }
   0x5   :  { %17 = vsyncpa [#allocation3], 0  ;;  %s62_s29 = sshll.u32 %s673_s4, 4  ;;  %s437_s30 = scalar_lea.vmem %s43_s26, 16  ;;  %s63_s29 = int_to_ptr.vmem [resolvable:$true] %s62_s29 }
   0x6   :  { %p438_p0 = scmp.ne.s32.totalorder %s43_s26, %s437_s30  ;;  %p442_p1 = scmp.lt.s32.totalorder %s43_s26, %s43_s26 }
   0x7   :  { %p443_p2 = scmp.lt.s32.totalorder %s437_s30, %s437_s30 }
   0x9   :  { %p444_p3 = por %p443_p2, %p442_p1 }
   0xb   :  { %p445_p4 = pnand %p444_p3, %p438_p0 }
   0xd   :  { %448 = shalt.err (!%p445_p4)
}
   0xe   :  { %s553_s8 = smov [#allocation7]   ;;  %s449_s9 = scalar_lea.vmem %s63_s29, 16 }
   0xf   :  { %45 = dma.vmem_to_smem %s43_s26, 16, %s553_s8, [#allocation8]  }
  0x10   :  { %p450_p5 = scmp.ne.s32.totalorder %s63_s29, %s449_s9  ;;  %p454_p6 = scmp.lt.s32.totalorder %s63_s29, %s63_s29 }
  0x11   :  { %p455_p7 = scmp.lt.s32.totalorder %s449_s9, %s449_s9 }
  0x13   :  { %p456_p8 = por %p455_p7, %p454_p6 }
  0x15   :  { %p457_p9 = pnand %p456_p8, %p450_p5 }
  0x17   :  { %460 = shalt.err (!%p457_p9)
}
  0x18   :  { %s554_s2 = smov [#allocation10]   ;;  %s32_s11 = sshll.u32 %s670_s1, 4  ;;  %s33_s11 = int_to_ptr.vmem [resolvable:$true] %s32_s11 }
  0x19   :  { %65 = dma.vmem_to_smem %s63_s29, 16, %s554_s2, [#allocation11]  }
  0x1a   :  { %s461_s14 = scalar_lea.hbm %s669_s0, 16 }
  0x1b   :  { %p462_p10 = scmp.ne.s32.totalorder %s669_s0, %s461_s14  ;;  %p465_p11 = scmp.lt.u32.totalorder %s461_s14, %s669_s0 }
  0x1d   :  { %p467_p12 = pnand %p465_p11, %p462_p10 }
  0x1f   :  { %470 = shalt.err (!%p467_p12)
}
  0x20   :  { %s555_s19 = smov [#allocation2]   ;;  %s471_s1 = scalar_lea.vmem %s33_s11, 16 }
  0x21   :  { %25 = dma.hbm_to_smem %s669_s0, 16, %s555_s19, [#allocation4]  }
  0x22   :  { %p472_p13 = scmp.ne.s32.totalorder %s33_s11, %s471_s1  ;;  %p476_p0 = scmp.lt.s32.totalorder %s33_s11, %s33_s11 }
  0x23   :  { %p477_p1 = scmp.lt.s32.totalorder %s471_s1, %s471_s1 }
  0x25   :  { %p478_p2 = por %p477_p1, %p476_p0 }
  0x27   :  { %p479_p3 = pnand %p478_p2, %p472_p13 }
  0x29   :  { %482 = shalt.err (!%p479_p3)
}
  0x2a   :  { %s556_s22 = smov [#allocation6]   ;;  %s52_s25 = sshll.u32 %s672_s3, 4  ;;  %s53_s25 = int_to_ptr.vmem [resolvable:$true] %s52_s25 }
  0x2b   :  { %35 = dma.vmem_to_smem %s33_s11, 16, %s556_s22, [#allocation5]  }
  0x2c   :  { %s72_s28 = sshll.u32 %s674_s5, 4  ;;  %s483_s0 = scalar_lea.vmem %s53_s25, 16  ;;  %s73_s28 = int_to_ptr.vmem [resolvable:$true] %s72_s28 }
  0x2d   :  { %p484_p4 = scmp.ne.s32.totalorder %s53_s25, %s483_s0  ;;  %p488_p5 = scmp.lt.s32.totalorder %s53_s25, %s53_s25 }
  0x2e   :  { %p489_p6 = scmp.lt.s32.totalorder %s483_s0, %s483_s0 }
  0x30   :  { %p490_p7 = por %p489_p6, %p488_p5 }
  0x32   :  { %p491_p8 = pnand %p490_p7, %p484_p4 }
  0x34   :  { %494 = shalt.err (!%p491_p8)
}
  0x35   :  { %s557_s29 = smov [#allocation9]   ;;  %s495_s30 = scalar_lea.vmem %s73_s28, 16 }
  0x36   :  { %55 = dma.vmem_to_smem %s53_s25, 16, %s557_s29, [#allocation8]  }
  0x37   :  { %p496_p9 = scmp.ne.s32.totalorder %s73_s28, %s495_s30  ;;  %p500_p10 = scmp.lt.s32.totalorder %s73_s28, %s73_s28 }
  0x38   :  { %p501_p11 = scmp.lt.s32.totalorder %s495_s30, %s495_s30 }
  0x3a   :  { %p502_p12 = por %p501_p11, %p500_p10 }
  0x3c   :  { %p503_p13 = pnand %p502_p12, %p496_p9 }
  0x3e   :  { %506 = shalt.err (!%p503_p13)
}
  0x3f   :  { %s558_s3 = smov [#allocation12]   ;;  %s82_s9 = sshll.u32 %s675_s6, 4  ;;  %s83_s9 = int_to_ptr.vmem [resolvable:$true] %s82_s9 }
  0x40   :  { %75 = dma.vmem_to_smem %s73_s28, 16, %s558_s3, [#allocation11]  }
  0x41   :  { %s507_s2 = scalar_lea.vmem %s83_s9, 16  ;;  %p512_p1 = scmp.lt.s32.totalorder %s83_s9, %s83_s9 }
  0x42   :  { %p508_p0 = scmp.ne.s32.totalorder %s83_s9, %s507_s2  ;;  %p513_p2 = scmp.lt.s32.totalorder %s507_s2, %s507_s2 }
  0x44   :  { %p514_p3 = por %p513_p2, %p512_p1 }
  0x46   :  { %p515_p4 = pnand %p514_p3, %p508_p0 }
  0x48   :  { %518 = shalt.err (!%p515_p4)
}
  0x49   :  { %s559_s4 = smov [#allocation13]  }
  0x4a   :  { %85 = dma.vmem_to_smem %s83_s9, 16, %s559_s4, [#allocation14]  }
  0x4b   :  { %541 = dma.done.wait [#allocation4], 16  }
  0x4c   :  { %542 = vsyncadd [#allocation4], 4294967280 }
  0x4d   :  { %543 = dma.done.wait [#allocation5], 16  }
  0x4e   :  { %544 = vsyncadd [#allocation5], 4294967280 }
  0x4f   :  { %545 = dma.done.wait [#allocation8], 32  }
  0x50   :  { %546 = vsyncadd [#allocation8], 4294967264 }
  0x51   :  { %547 = dma.done.wait [#allocation11], 32  }
  0x52   :  { %548 = vsyncadd [#allocation11], 4294967264 }
  0x53   :  { %549 = dma.done.wait [#allocation14], 16  }
  0x54   :  { %550 = vsyncadd [#allocation14], 4294967280 }
  0x55   :  { %107 = sfence }
  0x56   :  { %v110_v0 = vlaneseq  ;;  %s136_s6 = sld [smem:[#allocation12]]  ;;  %v560_v1 = vmov 0.0  }
  0x57   :  { %s138_s10 = sld [smem:[#allocation13]]  ;;  %133 = vst [vmem:[#allocation15] sm:$0xff] %v560_v1  ;;  %134 = vst [vmem:[#allocation15 + $0x8] sm:$0xff] %v560_v1 }
  0x58   :  { %135 = vst [vmem:[#allocation15 + $0x10] sm:$0xff] %v560_v1  ;;  %v111_v2 = vshrl.u32 %v110_v0, 7  ;;  %v113_v3 = vand.u32 127, %v110_v0 }
  0x5a   :  { %v114_v4 = vmul.u32 128, %v111_v2 }
  0x5c   :  { %v115_v5 = vadd.s32 %v114_v4, %v113_v3  ;;  %p137_p5 = scmp.le.s32.totalorder %s136_s6, 1023 }
  0x5d   :  { %p139_p6 = scmp.ge.s32.totalorder %s138_s10, 0 }
  0x5e   :  { %v118_v6 = vcvt.s32.f32 %v115_v5 }
  0x5f   :  { %p634_p7 = pnand %p139_p6, %p137_p5 }
  0x60   :  { %v119_v7 = vadd.f32 0.5, %v118_v6  ;;  %s144_s12 = sld [smem:[#allocation2]] (!%p634_p7) }
  0x61   :  { %s147_s13 = sld [smem:[#allocation6]] (!%p634_p7) }
  0x62   :  { %v121_v8 = vmul.f32 0.03125, %v119_v7  ;;  %s153_s14 = sld [smem:[#allocation7]] (!%p634_p7) }
  0x63   :  { %s158_s15 = sld [smem:[#allocation9]] (!%p634_p7) }
  0x64   :  { %v122_v9 = vfloor.f32 %v121_v8  ;;  %s163_s16 = sld [smem:[#allocation10]] (!%p634_p7) }
  0x66   :  { %v123_v10 = vmul.f32 32.0, %v122_v9  ;;  %v145_v18 = vstv (!%p634_p7), %s144_s12 }
  0x67   :  { %v148_v19 = vstv (!%p634_p7), %s147_s13 }
  0x68   :  { %v124_v11 = vsub.f32 %v118_v6, %v123_v10  ;;  %v154_v24 = vstv (!%p634_p7), %s153_s14 }
  0x69   :  { %v159_v28 = vstv (!%p634_p7), %s158_s15 }
  0x6a   :  { %vm125_vm0 = vcmp.ge.f32.partialorder %v124_v11, 32.0  ;;  %vm128_vm1 = vcmp.lt.f32.partialorder %v124_v11, 0.0  ;;  %s373_s17 = sshll.u32 (!%p634_p7), %s163_s16, 3 }
  0x6b   :  { %v126_v12 = vsel %vm125_vm0, 1.0, %v560_v1  ;;  %v129_v13 = vsel %vm128_vm1, 1.0, %v560_v1  ;;  %s165_s18 = scalar_lea.vmem (!%p634_p7), [#allocation15], %s373_s17 }
  0x6c   :  { %v127_v14 = vadd.f32 %v126_v12, %v122_v9  ;;  %143 = sbr.rel (%p634_p7) target bundleno = 141 (0x8d), region = 61  ;;  %v166_v29 = vld [vmem:[%s165_s18] sm:$0xff] (!%p634_p7) }
  0x6e   :  { %v638_v15 = vsub.f32 %v127_v14, %v129_v13 }
  0x70   :  { %v131_v16 = vmul.f32 32.0, %v638_v15  ;;  %v149_v21 = vsub.f32 (!%p634_p7), %v638_v15, %v148_v19 }
  0x72   :  { %v641_v17 = vsub.f32 %v118_v6, %v131_v16  ;;  %v151_v23 = vmul.f32 (!%p634_p7), %v149_v21, %v149_v21 }
  0x74   :  { %v146_v20 = vsub.f32 %v641_v17, %v145_v18  ;;  %vm161_vm3 = vcmp.le.f32.partialorder %v151_v23, %v159_v28 }
  0x76   :  { %v150_v22 = vmul.f32 %v146_v20, %v146_v20 }
  0x78   :  { %v152_v25 = vadd.f32 %v151_v23, %v150_v22  ;;  %vm160_vm2 = vcmp.le.f32.partialorder %v150_v22, %v159_v28 }
  0x79   :  { %vm162_vm4 = vmand %vm160_vm2, %vm161_vm3 }
  0x7a   :  { %v155_v26 = vmul.f32 %v154_v24, %v152_v25 }
  0x7c   :  { %v156_v27 = vmul.f32 1.442695, %v155_v26 }
  0x7e   :  { %425 = vpow2.f32 %v156_v27 }
  0x88   :  { %v426_v30 = vpop.eup %425 }
  0x89   :  { %v167_v31 = vsel %vm162_vm4, %v426_v30, 0.0 }
  0x8a   :  { %v168_v32 = vmax.f32 %v166_v29, %v167_v31 }
  0x8c   :  { %169 = vst [vmem:[%s165_s18] sm:$0xff] %v168_v32 }
  0x8d PF:  { %s374_s19 = sld [smem:[#allocation12 + $0x1]] }
  0x8e   :  { %s375_s20 = sld [smem:[#allocation13 + $0x1]] }
  0x93   :  { %p171_p8 = scmp.le.s32.totalorder %s374_s19, 1023 }
  0x94   :  { %p173_p9 = scmp.ge.s32.totalorder %s375_s20, 0 }
  0x96   :  { %p174_p10 = pnand %p173_p9, %p171_p8 }
  0x97   :  { %s376_s21 = sld [smem:[#allocation2 + $0x1]] (!%p174_p10) }
  0x98   :  { %177 = sbr.rel (%p174_p10) target bundleno = 184 (0xb8), region = 65  ;;  %s377_s1 = sld [smem:[#allocation6 + $0x1]] (!%p174_p10) }
  0x99   :  { %s378_s22 = sld [smem:[#allocation7 + $0x1]] (!%p174_p10) }
  0x9a   :  { %s379_s23 = sld [smem:[#allocation9 + $0x1]] (!%p174_p10) }
  0x9b   :  { %s380_s24 = sld [smem:[#allocation10 + $0x1]] (!%p174_p10) }
  0x9d   :  { %v179_v33 = vstv (!%p174_p10), %s376_s21 }
  0x9e   :  { %v182_v34 = vstv (!%p174_p10), %s377_s1  ;;  %v180_v35 = vsub.f32 (!%p174_p10), %v641_v17, %v179_v33 }
  0x9f   :  { %v183_v36 = vsub.f32 %v638_v15, %v182_v34  ;;  %v188_v39 = vstv %s378_s22 }
  0xa0   :  { %v184_v37 = vmul.f32 %v180_v35, %v180_v35  ;;  %v193_v43 = vstv %s379_s23 }
  0xa1   :  { %v185_v38 = vmul.f32 %v183_v36, %v183_v36  ;;  %s381_s25 = sshll.u32 %s380_s24, 3 }
  0xa2   :  { %vm194_vm5 = vcmp.le.f32.partialorder %v184_v37, %v193_v43  ;;  %s199_s26 = scalar_lea.vmem [#allocation15], %s381_s25 }
  0xa3   :  { %v186_v40 = vadd.f32 %v185_v38, %v184_v37  ;;  %vm195_vm6 = vcmp.le.f32.partialorder %v185_v38, %v193_v43  ;;  %v200_v44 = vld [vmem:[%s199_s26] sm:$0xff] }
  0xa4   :  { %vm196_vm7 = vmand %vm194_vm5, %vm195_vm6 }
  0xa5   :  { %v189_v41 = vmul.f32 %v188_v39, %v186_v40 }
  0xa7   :  { %v190_v42 = vmul.f32 1.442695, %v189_v41 }
  0xa9   :  { %427 = vpow2.f32 %v190_v42 }
  0xb3   :  { %v428_v45 = vpop.eup %427 }
  0xb4   :  { %v201_v46 = vsel %vm196_vm7, %v428_v45, 0.0 }
  0xb5   :  { %v202_v47 = vmax.f32 %v200_v44, %v201_v46 }
  0xb7   :  { %203 = vst [vmem:[%s199_s26] sm:$0xff] %v202_v47 }
  0xb8 PF:  { %s382_s27 = sld [smem:[#allocation12 + $0x2]] }
  0xb9   :  { %s383_s28 = sld [smem:[#allocation13 + $0x2]] }
  0xbe   :  { %p205_p11 = scmp.le.s32.totalorder %s382_s27, 1023 }
  0xbf   :  { %p207_p12 = scmp.ge.s32.totalorder %s383_s28, 0 }
  0xc1   :  { %p208_p13 = pnand %p207_p12, %p205_p11 }
  0xc2   :  { %s384_s0 = sld [smem:[#allocation2 + $0x2]] (!%p208_p13) }
  0xc3   :  { %211 = sbr.rel (%p208_p13) target bundleno = 227 (0xe3), region = 69  ;;  %s385_s29 = sld [smem:[#allocation6 + $0x2]] (!%p208_p13) }
  0xc4   :  { %s386_s30 = sld [smem:[#allocation7 + $0x2]] (!%p208_p13) }
  0xc5   :  { %s387_s3 = sld [smem:[#allocation9 + $0x2]] (!%p208_p13) }
  0xc6   :  { %s388_s5 = sld [smem:[#allocation10 + $0x2]] (!%p208_p13) }
  0xc8   :  { %v213_v48 = vstv (!%p208_p13), %s384_s0 }
  0xc9   :  { %v216_v49 = vstv (!%p208_p13), %s385_s29  ;;  %v214_v50 = vsub.f32 (!%p208_p13), %v641_v17, %v213_v48 }
  0xca   :  { %v217_v51 = vsub.f32 %v638_v15, %v216_v49  ;;  %v222_v54 = vstv %s386_s30 }
  0xcb   :  { %v218_v52 = vmul.f32 %v214_v50, %v214_v50  ;;  %v227_v58 = vstv %s387_s3 }
  0xcc   :  { %v219_v53 = vmul.f32 %v217_v51, %v217_v51  ;;  %s389_s8 = sshll.u32 %s388_s5, 3 }
  0xcd   :  { %vm228_vm8 = vcmp.le.f32.partialorder %v218_v52, %v227_v58  ;;  %s233_s9 = scalar_lea.vmem [#allocation15], %s389_s8 }
  0xce   :  { %v220_v55 = vadd.f32 %v219_v53, %v218_v52  ;;  %vm229_vm9 = vcmp.le.f32.partialorder %v219_v53, %v227_v58  ;;  %v234_v59 = vld [vmem:[%s233_s9] sm:$0xff] }
  0xcf   :  { %vm230_vm10 = vmand %vm228_vm8, %vm229_vm9 }
  0xd0   :  { %v223_v56 = vmul.f32 %v222_v54, %v220_v55 }
  0xd2   :  { %v224_v57 = vmul.f32 1.442695, %v223_v56 }
  0xd4   :  { %429 = vpow2.f32 %v224_v57 }
  0xde   :  { %v430_v60 = vpop.eup %429 }
  0xdf   :  { %v235_v61 = vsel %vm230_vm10, %v430_v60, 0.0 }
  0xe0   :  { %v236_v62 = vmax.f32 %v234_v59, %v235_v61 }
  0xe2   :  { %237 = vst [vmem:[%s233_s9] sm:$0xff] %v236_v62 }
  0xe3 PF:  { %s390_s2 = sld [smem:[#allocation12 + $0x3]] }
  0xe4   :  { %s391_s4 = sld [smem:[#allocation13 + $0x3]] }
  0xe9   :  { %p239_p0 = scmp.le.s32.totalorder %s390_s2, 1023 }
  0xea   :  { %p241_p1 = scmp.ge.s32.totalorder %s391_s4, 0 }
  0xec   :  { %p242_p2 = pnand %p241_p1, %p239_p0 }
  0xed   :  { %s392_s6 = sld [smem:[#allocation2 + $0x3]] (!%p242_p2) }
  0xee   :  { %245 = sbr.rel (%p242_p2) target bundleno = 270 (0x10e), region = 73  ;;  %s393_s10 = sld [smem:[#allocation6 + $0x3]] (!%p242_p2) }
  0xef   :  { %s394_s11 = sld [smem:[#allocation7 + $0x3]] (!%p242_p2) }
  0xf0   :  { %s395_s12 = sld [smem:[#allocation9 + $0x3]] (!%p242_p2) }
  0xf1   :  { %s396_s13 = sld [smem:[#allocation10 + $0x3]] (!%p242_p2) }
  0xf3   :  { %v247_v63 = vstv (!%p242_p2), %s392_s6 }
  0xf4   :  { %v250_v0 = vstv (!%p242_p2), %s393_s10  ;;  %v248_v1 = vsub.f32 (!%p242_p2), %v641_v17, %v247_v63 }
  0xf5   :  { %v251_v2 = vsub.f32 %v638_v15, %v250_v0  ;;  %v256_v5 = vstv %s394_s11 }
  0xf6   :  { %v252_v3 = vmul.f32 %v248_v1, %v248_v1  ;;  %v261_v9 = vstv %s395_s12 }
  0xf7   :  { %v253_v4 = vmul.f32 %v251_v2, %v251_v2  ;;  %s397_s14 = sshll.u32 %s396_s13, 3 }
  0xf8   :  { %vm262_vm11 = vcmp.le.f32.partialorder %v252_v3, %v261_v9  ;;  %s267_s15 = scalar_lea.vmem [#allocation15], %s397_s14 }
  0xf9   :  { %v254_v6 = vadd.f32 %v253_v4, %v252_v3  ;;  %vm263_vm12 = vcmp.le.f32.partialorder %v253_v4, %v261_v9  ;;  %v268_v10 = vld [vmem:[%s267_s15] sm:$0xff] }
  0xfa   :  { %vm264_vm13 = vmand %vm262_vm11, %vm263_vm12 }
  0xfb   :  { %v257_v7 = vmul.f32 %v256_v5, %v254_v6 }
  0xfd   :  { %v258_v8 = vmul.f32 1.442695, %v257_v7 }
  0xff   :  { %431 = vpow2.f32 %v258_v8 }
 0x109   :  { %v432_v11 = vpop.eup %431 }
 0x10a   :  { %v269_v12 = vsel %vm264_vm13, %v432_v11, 0.0 }
 0x10b   :  { %v270_v13 = vmax.f32 %v268_v10, %v269_v12 }
 0x10d   :  { %271 = vst [vmem:[%s267_s15] sm:$0xff] %v270_v13 }
 0x10e PF:  { %s398_s16 = sld [smem:[#allocation12 + $0x4]] }
 0x10f   :  { %s399_s17 = sld [smem:[#allocation13 + $0x4]] }
 0x114   :  { %p273_p3 = scmp.le.s32.totalorder %s398_s16, 1023 }
 0x115   :  { %p275_p4 = scmp.ge.s32.totalorder %s399_s17, 0 }
 0x117   :  { %p276_p5 = pnand %p275_p4, %p273_p3 }
 0x118   :  { %s400_s18 = sld [smem:[#allocation2 + $0x4]] (!%p276_p5) }
 0x119   :  { %279 = sbr.rel (%p276_p5) target bundleno = 313 (0x139), region = 77  ;;  %s401_s19 = sld [smem:[#allocation6 + $0x4]] (!%p276_p5) }
 0x11a   :  { %s402_s20 = sld [smem:[#allocation7 + $0x4]] (!%p276_p5) }
 0x11b   :  { %s403_s21 = sld [smem:[#allocation9 + $0x4]] (!%p276_p5) }
 0x11c   :  { %s404_s1 = sld [smem:[#allocation10 + $0x4]] (!%p276_p5) }
 0x11e   :  { %v281_v14 = vstv (!%p276_p5), %s400_s18 }
 0x11f   :  { %v284_v16 = vstv (!%p276_p5), %s401_s19  ;;  %v282_v18 = vsub.f32 (!%p276_p5), %v641_v17, %v281_v14 }
 0x120   :  { %v285_v19 = vsub.f32 %v638_v15, %v284_v16  ;;  %v290_v22 = vstv %s402_s20 }
 0x121   :  { %v286_v20 = vmul.f32 %v282_v18, %v282_v18  ;;  %v295_v26 = vstv %s403_s21 }
 0x122   :  { %v287_v21 = vmul.f32 %v285_v19, %v285_v19  ;;  %s405_s22 = sshll.u32 %s404_s1, 3 }
 0x123   :  { %vm296_vm14 = vcmp.le.f32.partialorder %v286_v20, %v295_v26  ;;  %s301_s23 = scalar_lea.vmem [#allocation15], %s405_s22 }
 0x124   :  { %v288_v23 = vadd.f32 %v287_v21, %v286_v20  ;;  %vm297_vm15 = vcmp.le.f32.partialorder %v287_v21, %v295_v26  ;;  %v302_v27 = vld [vmem:[%s301_s23] sm:$0xff] }
 0x125   :  { %vm298_vm0 = vmand %vm296_vm14, %vm297_vm15 }
 0x126   :  { %v291_v24 = vmul.f32 %v290_v22, %v288_v23 }
 0x128   :  { %v292_v25 = vmul.f32 1.442695, %v291_v24 }
 0x12a   :  { %433 = vpow2.f32 %v292_v25 }
 0x134   :  { %v434_v28 = vpop.eup %433 }
 0x135   :  { %v303_v29 = vsel %vm298_vm0, %v434_v28, 0.0 }
 0x136   :  { %v304_v30 = vmax.f32 %v302_v27, %v303_v29 }
 0x138   :  { %305 = vst [vmem:[%s301_s23] sm:$0xff] %v304_v30 }
 0x139 PF:  { %s406_s24 = sld [smem:[#allocation12 + $0x5]] }
 0x13a   :  { %s407_s25 = sld [smem:[#allocation13 + $0x5]] }
 0x13f   :  { %p307_p6 = scmp.le.s32.totalorder %s406_s24, 1023 }
 0x140   :  { %p309_p7 = scmp.ge.s32.totalorder %s407_s25, 0 }
 0x142   :  { %p310_p8 = pnand %p309_p7, %p307_p6 }
 0x143   :  { %s408_s26 = sld [smem:[#allocation2 + $0x5]] (!%p310_p8) }
 0x144   :  { %313 = sbr.rel (%p310_p8) target bundleno = 356 (0x164), region = 81  ;;  %s409_s27 = sld [smem:[#allocation6 + $0x5]] (!%p310_p8) }
 0x145   :  { %s410_s28 = sld [smem:[#allocation7 + $0x5]] (!%p310_p8) }
 0x146   :  { %s411_s0 = sld [smem:[#allocation9 + $0x5]] (!%p310_p8) }
 0x147   :  { %s412_s29 = sld [smem:[#allocation10 + $0x5]] (!%p310_p8) }
 0x149   :  { %v315_v31 = vstv (!%p310_p8), %s408_s26 }
 0x14a   :  { %v318_v32 = vstv (!%p310_p8), %s409_s27  ;;  %v316_v33 = vsub.f32 (!%p310_p8), %v641_v17, %v315_v31 }
 0x14b   :  { %v319_v34 = vsub.f32 %v638_v15, %v318_v32  ;;  %v324_v37 = vstv %s410_s28 }
 0x14c   :  { %v320_v35 = vmul.f32 %v316_v33, %v316_v33  ;;  %v329_v41 = vstv %s411_s0 }
 0x14d   :  { %v321_v36 = vmul.f32 %v319_v34, %v319_v34  ;;  %s413_s30 = sshll.u32 %s412_s29, 3 }
 0x14e   :  { %vm330_vm1 = vcmp.le.f32.partialorder %v320_v35, %v329_v41  ;;  %s335_s3 = scalar_lea.vmem [#allocation15], %s413_s30 }
 0x14f   :  { %v322_v38 = vadd.f32 %v321_v36, %v320_v35  ;;  %vm331_vm2 = vcmp.le.f32.partialorder %v321_v36, %v329_v41  ;;  %v336_v42 = vld [vmem:[%s335_s3] sm:$0xff] }
 0x150   :  { %vm332_vm3 = vmand %vm330_vm1, %vm331_vm2 }
 0x151   :  { %v325_v39 = vmul.f32 %v324_v37, %v322_v38 }
 0x153   :  { %v326_v40 = vmul.f32 1.442695, %v325_v39 }
 0x155   :  { %435 = vpow2.f32 %v326_v40 }
 0x15f   :  { %v436_v43 = vpop.eup %435 }
 0x160   :  { %v337_v17 = vsel %vm332_vm3, %v436_v43, 0.0 }
 0x161   :  { %v338_v44 = vmax.f32 %v336_v42, %v337_v17 }
 0x163   :  { %339 = vst [vmem:[%s335_s3] sm:$0xff] %v338_v44 }
 0x164 PF:  { %s561_s5 = smov [#allocation15]  }
 0x165   :  { %s345_s8 = sshll.u32 %s561_s5, 4  ;;  %s346_s8 = int_to_ptr.vmem [resolvable:$true] %s345_s8 }
 0x166   :  { %s519_s9 = scalar_lea.vmem %s346_s8, 384  ;;  %p524_p10 = scmp.lt.s32.totalorder %s346_s8, %s346_s8 }
 0x167   :  { %p520_p9 = scmp.ne.s32.totalorder %s346_s8, %s519_s9  ;;  %p525_p11 = scmp.lt.s32.totalorder %s519_s9, %s519_s9 }
 0x169   :  { %p526_p12 = por %p525_p11, %p524_p10 }
 0x16b   :  { %p527_p13 = pnand %p526_p12, %p520_p9 }
 0x16d   :  { %530 = shalt.err (!%p527_p13)
}
 0x16e   :  { %s531_s6 = scalar_lea.hbm %s676_s7, 384 }
 0x16f   :  { %p532_p0 = scmp.ne.s32.totalorder %s676_s7, %s531_s6  ;;  %p535_p1 = scmp.lt.u32.totalorder %s531_s6, %s676_s7 }
 0x171   :  { %p537_p2 = pnand %p535_p1, %p532_p0 }
 0x173   :  { %540 = shalt.err (!%p537_p2)
}
 0x174   :  { %s562_s14 = smov 128   ;;  %s563_s15 = smov 8  }
 0x175   :  { %351 = dma.vmem_to_hbm [thread:$0]  %s346_s8, 384, %s676_s7, [#allocation3], %s562_s14, %s562_s14, %s563_s15  }
 0x176   :  { %551 = dma.done.wait [#allocation3], 384  }
 0x177   :  { %552 = vsyncadd [#allocation3], 4294966912 }
 0x178   :  { %355 = vsyncpa [#allocation3], 1 }
 0x179   :  { %356 = vsyncpa [#allocation4], 1 }
 0x17a   :  { %357 = vsyncpa [#allocation5], 1 }
 0x17b   :  { %358 = vsyncpa [#allocation8], 1 }
 0x17c   :  { %359 = vsyncpa [#allocation11], 1 }
 0x17d   :  { %360 = vsyncpa [#allocation14], 1 }

</bundles_post_ra>
